<compile_context>
chip_gen: v7x
topology: tpu7x:2x2x1
jax: 0.10.0
libtpu: 0.0.40
codegen_flags: <defaults>
</compile_context>

<pallas_src>
import math

import jax
import jax.numpy as jnp
from jax import lax
from jax.experimental import pallas as pl
from jax.experimental.pallas import tpu as pltpu


def _round_up(x, m):
    return ((x + m - 1) // m) * m


def make_scnet_kernel(num_layer, num_subcarriers, kn_pad, bn_eps=1e-5):
    """Whole forward (all layers) in one kernel invocation.

    Ref shapes:
      x0    (B, 1, N)         random init of x_est
      C     (B, N, KNp+KM)    fused [BB | Bm] constants (lane-dense, BB padded)
      zB    (B, 1, KNp)       folded / padded zB
      z     (B, 1, KM)        folded z
      S     (B, KNp, N)       stacked identity (sums the K subcarrier blocks)
      wx, gamma, beta (L, 1, N);   wkl (L, 1, KNp)
      xout  (B, 1, N);  dis (L, 1, 1)
    """
    L = num_layer
    K = num_subcarriers
    KNp = kn_pad

    def kernel(x0_ref, C_ref, zB_ref, z_ref, S_ref,
               wx_ref, wkl_ref, gamma_ref, beta_ref,
               xout_ref, dis_ref):
        Bsz = x0_ref.shape[0]
        KM = z_ref.shape[2]
        M = KM // K
        inv_bm = 1.0 / float(Bsz * M)

        def bdot(lhs, rhs):
            # (B, 1, X) x (B, X, F) -> (B, 1, F) batched MXU contraction.
            return lax.dot_general(
                lhs, rhs,
                dimension_numbers=(((2,), (1,)), ((0,), (0,))),
                preferred_element_type=jnp.float32)

        def dist(pred):
            # sum_k mean_{b,m} (z - x^T B)^2, as a (1, 1) block.
            d = z_ref[...] - pred
            return jnp.zeros((1, 1), jnp.float32) + jnp.sum(d * d) * inv_bm

        def layer_update(l, x_est, aux):
            # VectorLinear_KL (Keep_Bias=False): per-subcarrier elementwise
            # scale, then reduce the K subcarrier blocks with one MXU matmul
            # against the stacked identity (replaces K unaligned lane slices).
            corr = (aux - zB_ref[...]) * wkl_ref[l]            # (B, 1, KNp)
            red = bdot(corr, S_ref[...])                       # (B, 1, N)
            out_x = x_est * wx_ref[l] + red                    # VectorLinear_x
            # BatchNorm1d, training-mode batch statistics (biased variance).
            mean = jnp.mean(out_x, axis=0, keepdims=True)
            var = jnp.mean(jnp.square(out_x - mean), axis=0, keepdims=True)
            x_bn = (out_x - mean) * lax.rsqrt(var + bn_eps)
            return x_bn * gamma_ref[l] + beta_ref[l]

        def hidden_body(l, x_est):
            # One fused contraction gives both this layer's BB term and the
            # previous layer's distance prediction (x_est == prev layer out).
            comb = bdot(x_est, C_ref[...])                     # (B, 1, KNp+KM)

            @pl.when(l > 0)
            def _():
                dis_ref[l - 1] = dist(comb[:, :, KNp:])

            x_bn = layer_update(l, x_est, comb[:, :, :KNp])
            return jnp.maximum(x_bn, 0.0)                      # hidden: relu

        x_est = x0_ref[...]
        if L > 1:
            x_est = lax.fori_loop(0, L - 1, hidden_body, x_est)

        # Last layer (static index L-1).  Activation
        #   -1 + relu(x+0.5)/0.5 - relu(x-0.5)/0.5  ==  clamp(2x, -1, 1)
        comb = bdot(x_est, C_ref[...])
        if L > 1:
            dis_ref[L - 2] = dist(comb[:, :, KNp:])
        x_bn = layer_update(L - 1, x_est, comb[:, :, :KNp])
        x_final = jnp.clip(2.0 * x_bn, -1.0, 1.0)
        xout_ref[...] = x_final

        # Epilogue: last layer's distance (Bm half of the fused constant only).
        pred_last = bdot(x_final, C_ref[:, :, KNp:])
        dis_ref[L - 1] = dist(pred_last)

    return kernel


def scnet_wideband_forward(BB, zB, x, z, Bmat, params, *,
                           num_layer, num_subcarriers, loss_scalar, init_key,
                           bn_eps=1e-5):
    """Mirrors ScNet_Wideband.forward (unsupervised, Keep_Bias=False, BN=True).

    BB: (B, N, N, K)   zB: (B, N, K)   x: (B, N)
    z:  (B, M, K)      Bmat: (B, N, M, K)
    Returns (x_est, LOSS-list), like the PyTorch module.
    """
    batch, N = x.shape
    M = z.shape[1]
    K = num_subcarriers
    KN, KM = K * N, K * M
    KNp = _round_up(KN, 128)
    pad = KNp - KN
    f32 = jnp.float32

    # ---- lane-dense layout: fold the subcarrier axis into the lane dim ----
    BB_f = jnp.transpose(BB.astype(f32), (0, 1, 3, 2)).reshape(batch, N, KN)
    Bm_f = jnp.transpose(Bmat.astype(f32), (0, 1, 3, 2)).reshape(batch, N, KM)
    zB_f = jnp.transpose(zB.astype(f32), (0, 2, 1)).reshape(batch, 1, KN)
    z_f = jnp.transpose(z.astype(f32), (0, 2, 1)).reshape(batch, 1, KM)
    if pad:  # pad the BB block so the aux/pred lane split is 128-aligned
        BB_f = jnp.pad(BB_f, ((0, 0), (0, 0), (0, pad)))
        zB_f = jnp.pad(zB_f, ((0, 0), (0, 0), (0, pad)))
    C = jnp.concatenate([BB_f, Bm_f], axis=-1)                # (B, N, KNp+KM)

    # Stacked identity that sums the K subcarrier blocks on the MXU.
    S = jnp.tile(jnp.eye(N, dtype=f32), (K, 1))               # (KN, N)
    if pad:
        S = jnp.pad(S, ((0, pad), (0, 0)))
    S_b = jnp.broadcast_to(S[None], (batch, KNp, N))          # (B, KNp, N)

    w_x = params["w_x"].astype(f32).reshape(num_layer, 1, N)
    w_kl = params["w_kl"].astype(f32).reshape(num_layer, 1, KN)
    if pad:
        w_kl = jnp.pad(w_kl, ((0, 0), (0, 0), (0, pad)))
    gamma = params["gamma"].astype(f32).reshape(num_layer, 1, N)
    beta = params["beta"].astype(f32).reshape(num_layer, 1, N)

    # x_est = torch.randn_like(x)  (random init; deterministic key here)
    x0 = jax.random.normal(init_key, (batch, 1, N), f32)

    # ---- VMEM budget: everything is resident for the single invocation ----
    f32b = 4
    resident = f32b * (x0.size + C.size + zB_f.size + z_f.size + S_b.size +
                       w_x.size + w_kl.size + gamma.size + beta.size +
                       batch * N + num_layer)
    try:
        vmem_cap = int(pltpu.get_tpu_info().vmem_capacity_bytes)
    except Exception:  # conservative fallback if the query is unavailable
        vmem_cap = 64 << 20
    # leave ~15% headroom for Mosaic internal scratch
    vmem_limit = int(min(max(2 * resident, 16 << 20), int(0.85 * vmem_cap)))
    # TODO(synk): if `resident` ever exceeds ~85% of VMEM (very large B/N/K),
    # tile the subcarrier axis with a grid instead of full residency.

    kernel = make_scnet_kernel(num_layer, K, KNp, bn_eps)
    vmem = pltpu.MemorySpace.VMEM
    x_out, dis = pl.pallas_call(
        kernel,
        out_shape=(jax.ShapeDtypeStruct((batch, 1, N), f32),
                   jax.ShapeDtypeStruct((num_layer, 1, 1), f32)),
        in_specs=[pl.BlockSpec(memory_space=vmem)] * 9,
        out_specs=(pl.BlockSpec(memory_space=vmem),
                   pl.BlockSpec(memory_space=vmem)),
        compiler_params=pltpu.CompilerParams(vmem_limit_bytes=vmem_limit),
    )(x0, C, zB_f, z_f, S_b, w_x, w_kl, gamma, beta)

    x_est = x_out.reshape(batch, N)
    dis_vals = dis[:, 0, 0]                                   # (num_layer,)
    # LOSS[l] = scalar * np.log(l + 1) * dis_sum  (log(1) == 0 for layer 0)
    losses = [loss_scalar * math.log(l + 1) * dis_vals[l] for l in range(num_layer)]
    # TODO(synk): the 'supervised' loss branch and BatchNorm running-stat
    # updates are stateful / unused in the default config and not reproduced.
    return x_est, losses


def init_params(key, num_layer, num_subcarriers, N):
    k1, k2 = jax.random.split(key)
    # VectorLinear.reset_parameters -> normal(std=0.01); Keep_Bias=False -> no bias
    w_x = 0.01 * jax.random.normal(k1, (num_layer, 1, N), jnp.float32)
    w_kl = 0.01 * jax.random.normal(k2, (num_layer, num_subcarriers, N), jnp.float32)
    # BatchNorm1d affine params (PyTorch default init)
    gamma = jnp.ones((num_layer, 1, N), jnp.float32)
    beta = jnp.zeros((num_layer, 1, N), jnp.float32)
    return {"w_x": w_x, "w_kl": w_kl, "gamma": gamma, "beta": beta}


if __name__ == "__main__":
    # small but representative shapes (K*N = K*M = 128 -> lane-dense)
    batch = 2
    N = 32            # in_dim (feature length of x)
    M = 32            # measurement length per subcarrier
    K = 4             # num_subcarriers
    num_layer = 3
    loss_scalar = 10.0

    root = jax.random.PRNGKey(0)
    k_bb, k_zb, k_x, k_z, k_b, k_p, k_init = jax.random.split(root, 7)

    BB = jax.random.normal(k_bb, (batch, N, N, K), jnp.float32)
    zB = jax.random.normal(k_zb, (batch, N, K), jnp.float32)
    x = jax.random.normal(k_x, (batch, N), jnp.float32)
    z = jax.random.normal(k_z, (batch, M, K), jnp.float32)
    Bmat = jax.random.normal(k_b, (batch, N, M, K), jnp.float32)

    params = init_params(k_p, num_layer, K, N)

    x_est, LOSS = scnet_wideband_forward(
        BB, zB, x, z, Bmat, params,
        num_layer=num_layer, num_subcarriers=K,
        loss_scalar=loss_scalar, init_key=k_init)

    x_est = jax.block_until_ready(x_est)
    LOSS = [jax.block_until_ready(li) for li in LOSS]

    assert x_est.shape == (batch, N)
    assert len(LOSS) == num_layer
    assert all(bool(jnp.isfinite(li)) for li in LOSS)
    assert bool(jnp.all(jnp.isfinite(x_est)))
    print("KERNEL_OK")
</pallas_src>

<mosaic_0001>
module attributes {stable_mosaic.version = 11 : i64} {
  func.func @kernel(%arg0: memref<2x1x32xf32, #tpu.memory_space<vmem>>, %arg1: memref<2x32x256xf32, #tpu.memory_space<vmem>>, %arg2: memref<2x1x128xf32, #tpu.memory_space<vmem>>, %arg3: memref<2x1x128xf32, #tpu.memory_space<vmem>>, %arg4: memref<2x128x32xf32, #tpu.memory_space<vmem>>, %arg5: memref<3x1x32xf32, #tpu.memory_space<vmem>>, %arg6: memref<3x1x128xf32, #tpu.memory_space<vmem>>, %arg7: memref<3x1x32xf32, #tpu.memory_space<vmem>>, %arg8: memref<3x1x32xf32, #tpu.memory_space<vmem>>, %arg9: memref<2x1x32xf32, #tpu.memory_space<vmem>>, %arg10: memref<3x1x1xf32, #tpu.memory_space<vmem>>) attributes {dimension_semantics = [], scalar_prefetch = 0 : i64, scratch_operands = 0 : i64, tpu.core_type = #tpu.core_type<tc>} {
    %c0 = arith.constant 0 : index
    %c0_0 = arith.constant 0 : index
    %c0_1 = arith.constant 0 : index
    %0 = vector.load %arg0[%c0, %c0_0, %c0_1] : memref<2x1x32xf32, #tpu.memory_space<vmem>>, vector<2x1x32xf32>
    %c0_i32 = arith.constant 0 : i32
    %c2_i32 = arith.constant 2 : i32
    %1 = arith.addi %c0_i32, %c2_i32 : i32
    %c1_i32 = arith.constant 1 : i32
    %2 = scf.for %arg11 = %c0_i32 to %1 step %c1_i32 iter_args(%arg12 = %0) -> (vector<2x1x32xf32>)  : i32 {
      %c0_55 = arith.constant 0 : index
      %c0_56 = arith.constant 0 : index
      %c0_57 = arith.constant 0 : index
      %87 = vector.load %arg1[%c0_55, %c0_56, %c0_57] : memref<2x32x256xf32, #tpu.memory_space<vmem>>, vector<2x32x256xf32>
      %cst_58 = arith.constant dense<0.000000e+00> : vector<2x1x256xf32>
      %88 = tpu.matmul %arg12, %87, %cst_58 {dimension_numbers = #tpu.dot_dimension_numbers<[2], [1], [1], [2], [0, 0, 0, 1, 1, 2], [0], [0]>} : vector<2x1x32xf32>, vector<2x32x256xf32>, vector<2x1x256xf32> -> vector<2x1x256xf32>
      %c0_i32_59 = arith.constant 0 : i32
      %89 = arith.cmpi sgt, %arg11, %c0_i32_59 : i32
      %90 = arith.extui %89 : i1 to i32
      %c0_i32_60 = arith.constant 0 : i32
      %91 = arith.cmpi ne, %90, %c0_i32_60 : i32
      scf.if %91 {
        %142 = vector.extract_strided_slice %88 {offsets = [0, 0, 128], sizes = [2, 1, 128], strides = [1, 1, 1]} : vector<2x1x256xf32> to vector<2x1x128xf32>
        %c0_82 = arith.constant 0 : index
        %c0_83 = arith.constant 0 : index
        %c0_84 = arith.constant 0 : index
        %143 = vector.load %arg3[%c0_82, %c0_83, %c0_84] : memref<2x1x128xf32, #tpu.memory_space<vmem>>, vector<2x1x128xf32>
        %144 = arith.subf %143, %142 : vector<2x1x128xf32>
        %cst_85 = arith.constant 0.000000e+00 : f32
        %145 = vector.broadcast %cst_85 : f32 to vector<1x1xf32>
        %146 = arith.mulf %144, %144 : vector<2x1x128xf32>
        %147 = vector.shape_cast %146 : vector<2x1x128xf32> to vector<1x2x1x128xf32>
        %cst_86 = arith.constant dense<0.000000e+00> : vector<1xf32>
        %148 = vector.multi_reduction <add>, %147, %cst_86 [1, 2, 3] : vector<1x2x1x128xf32> to vector<1xf32>
        %149 = vector.shape_cast %148 : vector<1xf32> to vector<1x1x1x1xf32>
        %150 = vector.extract %149[0, 0, 0, 0] : f32 from vector<1x1x1x1xf32>
        %cst_87 = arith.constant 1.562500e-02 : f32
        %151 = arith.mulf %150, %cst_87 : f32
        %152 = vector.broadcast %151 : f32 to vector<1x1xf32>
        %153 = arith.addf %145, %152 : vector<1x1xf32>
        %c1_i32_88 = arith.constant 1 : i32
        %154 = arith.subi %arg11, %c1_i32_88 : i32
        %155 = arith.index_cast %154 : i32 to index
        %c0_89 = arith.constant 0 : index
        %c0_90 = arith.constant 0 : index
        %156 = vector.load %arg10[%155, %c0_89, %c0_90] : memref<3x1x1xf32, #tpu.memory_space<vmem>>, vector<1x1x1xf32>
        %157 = vector.shape_cast %156 : vector<1x1x1xf32> to vector<1x1xf32>
        %158 = vector.shape_cast %153 : vector<1x1xf32> to vector<1x1x1xf32>
        tpu.vector_store %arg10[%155, %c0_89, %c0_90], %158 {strides = array<i32>} : memref<3x1x1xf32, #tpu.memory_space<vmem>>, vector<1x1x1xf32>,
      } else {
      }
      %92 = vector.extract_strided_slice %88 {offsets = [0, 0, 0], sizes = [2, 1, 128], strides = [1, 1, 1]} : vector<2x1x256xf32> to vector<2x1x128xf32>
      %c0_61 = arith.constant 0 : index
      %c0_62 = arith.constant 0 : index
      %c0_63 = arith.constant 0 : index
      %93 = vector.load %arg2[%c0_61, %c0_62, %c0_63] : memref<2x1x128xf32, #tpu.memory_space<vmem>>, vector<2x1x128xf32>
      %94 = arith.subf %92, %93 : vector<2x1x128xf32>
      %95 = arith.index_cast %arg11 : i32 to index
      %c0_64 = arith.constant 0 : index
      %c0_65 = arith.constant 0 : index
      %96 = vector.load %arg6[%95, %c0_64, %c0_65] : memref<3x1x128xf32, #tpu.memory_space<vmem>>, vector<1x1x128xf32>
      %97 = vector.shape_cast %96 : vector<1x1x128xf32> to vector<1x128xf32>
      %98 = vector.shape_cast %97 : vector<1x128xf32> to vector<1x1x128xf32>
      %99 = vector.broadcast %98 : vector<1x1x128xf32> to vector<2x1x128xf32>
      %100 = arith.mulf %94, %99 : vector<2x1x128xf32>
      %c0_66 = arith.constant 0 : index
      %c0_67 = arith.constant 0 : index
      %c0_68 = arith.constant 0 : index
      %101 = vector.load %arg4[%c0_66, %c0_67, %c0_68] : memref<2x128x32xf32, #tpu.memory_space<vmem>>, vector<2x128x32xf32>
      %cst_69 = arith.constant dense<0.000000e+00> : vector<2x1x32xf32>
      %102 = tpu.matmul %100, %101, %cst_69 {dimension_numbers = #tpu.dot_dimension_numbers<[2], [1], [1], [2], [0, 0, 0, 1, 1, 2], [0], [0]>} : vector<2x1x128xf32>, vector<2x128x32xf32>, vector<2x1x32xf32> -> vector<2x1x32xf32>
      %103 = arith.index_cast %arg11 : i32 to index
      %c0_70 = arith.constant 0 : index
      %c0_71 = arith.constant 0 : index
      %104 = vector.load %arg5[%103, %c0_70, %c0_71] : memref<3x1x32xf32, #tpu.memory_space<vmem>>, vector<1x1x32xf32>
      %105 = vector.shape_cast %104 : vector<1x1x32xf32> to vector<1x32xf32>
      %106 = vector.shape_cast %105 : vector<1x32xf32> to vector<1x1x32xf32>
      %107 = vector.broadcast %106 : vector<1x1x32xf32> to vector<2x1x32xf32>
      %108 = arith.mulf %arg12, %107 : vector<2x1x32xf32>
      %109 = arith.addf %108, %102 : vector<2x1x32xf32>
      %cst_72 = arith.constant dense<0.000000e+00> : vector<1x32xf32>
      %110 = vector.multi_reduction <add>, %109, %cst_72 [0] : vector<2x1x32xf32> to vector<1x32xf32>
      %111 = vector.shape_cast %110 : vector<1x32xf32> to vector<1x1x32xf32>
      %cst_73 = arith.constant 2.000000e+00 : f32
      %112 = vector.broadcast %cst_73 : f32 to vector<1x1x32xf32>
      %113 = arith.divf %111, %112 : vector<1x1x32xf32>
      %114 = vector.broadcast %113 : vector<1x1x32xf32> to vector<2x1x32xf32>
      %115 = arith.subf %109, %114 : vector<2x1x32xf32>
      %116 = arith.mulf %115, %115 : vector<2x1x32xf32>
      %cst_74 = arith.constant dense<0.000000e+00> : vector<1x32xf32>
      %117 = vector.multi_reduction <add>, %116, %cst_74 [0] : vector<2x1x32xf32> to vector<1x32xf32>
      %118 = vector.shape_cast %117 : vector<1x32xf32> to vector<1x1x32xf32>
      %cst_75 = arith.constant 2.000000e+00 : f32
      %119 = vector.broadcast %cst_75 : f32 to vector<1x1x32xf32>
      %120 = arith.divf %118, %119 : vector<1x1x32xf32>
      %121 = vector.broadcast %113 : vector<1x1x32xf32> to vector<2x1x32xf32>
      %122 = arith.subf %109, %121 : vector<2x1x32xf32>
      %cst_76 = arith.constant 9.99999974E-6 : f32
      %123 = vector.broadcast %cst_76 : f32 to vector<1x1x32xf32>
      %124 = arith.addf %120, %123 : vector<1x1x32xf32>
      %125 = math.rsqrt %124 : vector<1x1x32xf32>
      %126 = vector.broadcast %125 : vector<1x1x32xf32> to vector<2x1x32xf32>
      %127 = arith.mulf %122, %126 : vector<2x1x32xf32>
      %128 = arith.index_cast %arg11 : i32 to index
      %c0_77 = arith.constant 0 : index
      %c0_78 = arith.constant 0 : index
      %129 = vector.load %arg7[%128, %c0_77, %c0_78] : memref<3x1x32xf32, #tpu.memory_space<vmem>>, vector<1x1x32xf32>
      %130 = vector.shape_cast %129 : vector<1x1x32xf32> to vector<1x32xf32>
      %131 = vector.shape_cast %130 : vector<1x32xf32> to vector<1x1x32xf32>
      %132 = vector.broadcast %131 : vector<1x1x32xf32> to vector<2x1x32xf32>
      %133 = arith.mulf %127, %132 : vector<2x1x32xf32>
      %134 = arith.index_cast %arg11 : i32 to index
      %c0_79 = arith.constant 0 : index
      %c0_80 = arith.constant 0 : index
      %135 = vector.load %arg8[%134, %c0_79, %c0_80] : memref<3x1x32xf32, #tpu.memory_space<vmem>>, vector<1x1x32xf32>
      %136 = vector.shape_cast %135 : vector<1x1x32xf32> to vector<1x32xf32>
      %137 = vector.shape_cast %136 : vector<1x32xf32> to vector<1x1x32xf32>
      %138 = vector.broadcast %137 : vector<1x1x32xf32> to vector<2x1x32xf32>
      %139 = arith.addf %133, %138 : vector<2x1x32xf32>
      %cst_81 = arith.constant 0.000000e+00 : f32
      %140 = vector.broadcast %cst_81 : f32 to vector<2x1x32xf32>
      %141 = arith.maximumf %139, %140 : vector<2x1x32xf32>
      scf.yield %141 : vector<2x1x32xf32>
    }
    %c2_i32_2 = arith.constant 2 : i32
    %c0_3 = arith.constant 0 : index
    %c0_4 = arith.constant 0 : index
    %c0_5 = arith.constant 0 : index
    %3 = vector.load %arg1[%c0_3, %c0_4, %c0_5] : memref<2x32x256xf32, #tpu.memory_space<vmem>>, vector<2x32x256xf32>
    %cst = arith.constant dense<0.000000e+00> : vector<2x1x256xf32>
    %4 = tpu.matmul %2, %3, %cst {dimension_numbers = #tpu.dot_dimension_numbers<[2], [1], [1], [2], [0, 0, 0, 1, 1, 2], [0], [0]>} : vector<2x1x32xf32>, vector<2x32x256xf32>, vector<2x1x256xf32> -> vector<2x1x256xf32>
    %5 = vector.extract_strided_slice %4 {offsets = [0, 0, 128], sizes = [2, 1, 128], strides = [1, 1, 1]} : vector<2x1x256xf32> to vector<2x1x128xf32>
    %c0_6 = arith.constant 0 : index
    %c0_7 = arith.constant 0 : index
    %c0_8 = arith.constant 0 : index
    %6 = vector.load %arg3[%c0_6, %c0_7, %c0_8] : memref<2x1x128xf32, #tpu.memory_space<vmem>>, vector<2x1x128xf32>
    %7 = arith.subf %6, %5 : vector<2x1x128xf32>
    %cst_9 = arith.constant 0.000000e+00 : f32
    %8 = vector.broadcast %cst_9 : f32 to vector<1x1xf32>
    %9 = arith.mulf %7, %7 : vector<2x1x128xf32>
    %10 = vector.shape_cast %9 : vector<2x1x128xf32> to vector<1x2x1x128xf32>
    %cst_10 = arith.constant dense<0.000000e+00> : vector<1xf32>
    %11 = vector.multi_reduction <add>, %10, %cst_10 [1, 2, 3] : vector<1x2x1x128xf32> to vector<1xf32>
    %12 = vector.shape_cast %11 : vector<1xf32> to vector<1x1x1x1xf32>
    %13 = vector.extract %12[0, 0, 0, 0] : f32 from vector<1x1x1x1xf32>
    %cst_11 = arith.constant 1.562500e-02 : f32
    %14 = arith.mulf %13, %cst_11 : f32
    %15 = vector.broadcast %14 : f32 to vector<1x1xf32>
    %16 = arith.addf %8, %15 : vector<1x1xf32>
    %c1 = arith.constant 1 : index
    %c0_12 = arith.constant 0 : index
    %c0_13 = arith.constant 0 : index
    %17 = vector.load %arg10[%c1, %c0_12, %c0_13] : memref<3x1x1xf32, #tpu.memory_space<vmem>>, vector<1x1x1xf32>
    %18 = vector.shape_cast %17 : vector<1x1x1xf32> to vector<1x1xf32>
    %19 = vector.shape_cast %16 : vector<1x1xf32> to vector<1x1x1xf32>
    tpu.vector_store %arg10[%c1, %c0_12, %c0_13], %19 {strides = array<i32>} : memref<3x1x1xf32, #tpu.memory_space<vmem>>, vector<1x1x1xf32>,
    %20 = vector.extract_strided_slice %4 {offsets = [0, 0, 0], sizes = [2, 1, 128], strides = [1, 1, 1]} : vector<2x1x256xf32> to vector<2x1x128xf32>
    %c0_14 = arith.constant 0 : index
    %c0_15 = arith.constant 0 : index
    %c0_16 = arith.constant 0 : index
    %21 = vector.load %arg2[%c0_14, %c0_15, %c0_16] : memref<2x1x128xf32, #tpu.memory_space<vmem>>, vector<2x1x128xf32>
    %22 = arith.subf %20, %21 : vector<2x1x128xf32>
    %c2 = arith.constant 2 : index
    %c0_17 = arith.constant 0 : index
    %c0_18 = arith.constant 0 : index
    %23 = vector.load %arg6[%c2, %c0_17, %c0_18] : memref<3x1x128xf32, #tpu.memory_space<vmem>>, vector<1x1x128xf32>
    %24 = vector.shape_cast %23 : vector<1x1x128xf32> to vector<1x128xf32>
    %25 = vector.shape_cast %24 : vector<1x128xf32> to vector<1x1x128xf32>
    %26 = vector.broadcast %25 : vector<1x1x128xf32> to vector<2x1x128xf32>
    %27 = arith.mulf %22, %26 : vector<2x1x128xf32>
    %c0_19 = arith.constant 0 : index
    %c0_20 = arith.constant 0 : index
    %c0_21 = arith.constant 0 : index
    %28 = vector.load %arg4[%c0_19, %c0_20, %c0_21] : memref<2x128x32xf32, #tpu.memory_space<vmem>>, vector<2x128x32xf32>
    %cst_22 = arith.constant dense<0.000000e+00> : vector<2x1x32xf32>
    %29 = tpu.matmul %27, %28, %cst_22 {dimension_numbers = #tpu.dot_dimension_numbers<[2], [1], [1], [2], [0, 0, 0, 1, 1, 2], [0], [0]>} : vector<2x1x128xf32>, vector<2x128x32xf32>, vector<2x1x32xf32> -> vector<2x1x32xf32>
    %c2_23 = arith.constant 2 : index
    %c0_24 = arith.constant 0 : index
    %c0_25 = arith.constant 0 : index
    %30 = vector.load %arg5[%c2_23, %c0_24, %c0_25] : memref<3x1x32xf32, #tpu.memory_space<vmem>>, vector<1x1x32xf32>
    %31 = vector.shape_cast %30 : vector<1x1x32xf32> to vector<1x32xf32>
    %32 = vector.shape_cast %31 : vector<1x32xf32> to vector<1x1x32xf32>
    %33 = vector.broadcast %32 : vector<1x1x32xf32> to vector<2x1x32xf32>
    %34 = arith.mulf %2, %33 : vector<2x1x32xf32>
    %35 = arith.addf %34, %29 : vector<2x1x32xf32>
    %cst_26 = arith.constant dense<0.000000e+00> : vector<1x32xf32>
    %36 = vector.multi_reduction <add>, %35, %cst_26 [0] : vector<2x1x32xf32> to vector<1x32xf32>
    %37 = vector.shape_cast %36 : vector<1x32xf32> to vector<1x1x32xf32>
    %cst_27 = arith.constant 2.000000e+00 : f32
    %38 = vector.broadcast %cst_27 : f32 to vector<1x1x32xf32>
    %39 = arith.divf %37, %38 : vector<1x1x32xf32>
    %40 = vector.broadcast %39 : vector<1x1x32xf32> to vector<2x1x32xf32>
    %41 = arith.subf %35, %40 : vector<2x1x32xf32>
    %42 = arith.mulf %41, %41 : vector<2x1x32xf32>
    %cst_28 = arith.constant dense<0.000000e+00> : vector<1x32xf32>
    %43 = vector.multi_reduction <add>, %42, %cst_28 [0] : vector<2x1x32xf32> to vector<1x32xf32>
    %44 = vector.shape_cast %43 : vector<1x32xf32> to vector<1x1x32xf32>
    %cst_29 = arith.constant 2.000000e+00 : f32
    %45 = vector.broadcast %cst_29 : f32 to vector<1x1x32xf32>
    %46 = arith.divf %44, %45 : vector<1x1x32xf32>
    %47 = vector.broadcast %39 : vector<1x1x32xf32> to vector<2x1x32xf32>
    %48 = arith.subf %35, %47 : vector<2x1x32xf32>
    %cst_30 = arith.constant 9.99999974E-6 : f32
    %49 = vector.broadcast %cst_30 : f32 to vector<1x1x32xf32>
    %50 = arith.addf %46, %49 : vector<1x1x32xf32>
    %51 = math.rsqrt %50 : vector<1x1x32xf32>
    %52 = vector.broadcast %51 : vector<1x1x32xf32> to vector<2x1x32xf32>
    %53 = arith.mulf %48, %52 : vector<2x1x32xf32>
    %c2_31 = arith.constant 2 : index
    %c0_32 = arith.constant 0 : index
    %c0_33 = arith.constant 0 : index
    %54 = vector.load %arg7[%c2_31, %c0_32, %c0_33] : memref<3x1x32xf32, #tpu.memory_space<vmem>>, vector<1x1x32xf32>
    %55 = vector.shape_cast %54 : vector<1x1x32xf32> to vector<1x32xf32>
    %56 = vector.shape_cast %55 : vector<1x32xf32> to vector<1x1x32xf32>
    %57 = vector.broadcast %56 : vector<1x1x32xf32> to vector<2x1x32xf32>
    %58 = arith.mulf %53, %57 : vector<2x1x32xf32>
    %c2_34 = arith.constant 2 : index
    %c0_35 = arith.constant 0 : index
    %c0_36 = arith.constant 0 : index
    %59 = vector.load %arg8[%c2_34, %c0_35, %c0_36] : memref<3x1x32xf32, #tpu.memory_space<vmem>>, vector<1x1x32xf32>
    %60 = vector.shape_cast %59 : vector<1x1x32xf32> to vector<1x32xf32>
    %61 = vector.shape_cast %60 : vector<1x32xf32> to vector<1x1x32xf32>
    %62 = vector.broadcast %61 : vector<1x1x32xf32> to vector<2x1x32xf32>
    %63 = arith.addf %58, %62 : vector<2x1x32xf32>
    %cst_37 = arith.constant 2.000000e+00 : f32
    %64 = vector.broadcast %cst_37 : f32 to vector<2x1x32xf32>
    %65 = arith.mulf %64, %63 : vector<2x1x32xf32>
    %cst_38 = arith.constant -1.000000e+00 : f32
    %cst_39 = arith.constant 1.000000e+00 : f32
    %66 = vector.broadcast %cst_38 : f32 to vector<2x1x32xf32>
    %67 = arith.maximumf %66, %65 : vector<2x1x32xf32>
    %68 = vector.broadcast %cst_39 : f32 to vector<2x1x32xf32>
    %69 = arith.minimumf %68, %67 : vector<2x1x32xf32>
    %c0_40 = arith.constant 0 : index
    %c0_41 = arith.constant 0 : index
    %c0_42 = arith.constant 0 : index
    %70 = vector.load %arg9[%c0_40, %c0_41, %c0_42] : memref<2x1x32xf32, #tpu.memory_space<vmem>>, vector<2x1x32xf32>
    tpu.vector_store %arg9[%c0_40, %c0_41, %c0_42], %69 {strides = array<i32>} : memref<2x1x32xf32, #tpu.memory_space<vmem>>, vector<2x1x32xf32>,
    %c0_43 = arith.constant 0 : index
    %c0_44 = arith.constant 0 : index
    %c128 = arith.constant 128 : index
    %71 = vector.load %arg1[%c0_43, %c0_44, %c128] : memref<2x32x256xf32, #tpu.memory_space<vmem>>, vector<2x32x128xf32>
    %cst_45 = arith.constant dense<0.000000e+00> : vector<2x1x128xf32>
    %72 = tpu.matmul %69, %71, %cst_45 {dimension_numbers = #tpu.dot_dimension_numbers<[2], [1], [1], [2], [0, 0, 0, 1, 1, 2], [0], [0]>} : vector<2x1x32xf32>, vector<2x32x128xf32>, vector<2x1x128xf32> -> vector<2x1x128xf32>
    %c0_46 = arith.constant 0 : index
    %c0_47 = arith.constant 0 : index
    %c0_48 = arith.constant 0 : index
    %73 = vector.load %arg3[%c0_46, %c0_47, %c0_48] : memref<2x1x128xf32, #tpu.memory_space<vmem>>, vector<2x1x128xf32>
    %74 = arith.subf %73, %72 : vector<2x1x128xf32>
    %cst_49 = arith.constant 0.000000e+00 : f32
    %75 = vector.broadcast %cst_49 : f32 to vector<1x1xf32>
    %76 = arith.mulf %74, %74 : vector<2x1x128xf32>
    %77 = vector.shape_cast %76 : vector<2x1x128xf32> to vector<1x2x1x128xf32>
    %cst_50 = arith.constant dense<0.000000e+00> : vector<1xf32>
    %78 = vector.multi_reduction <add>, %77, %cst_50 [1, 2, 3] : vector<1x2x1x128xf32> to vector<1xf32>
    %79 = vector.shape_cast %78 : vector<1xf32> to vector<1x1x1x1xf32>
    %80 = vector.extract %79[0, 0, 0, 0] : f32 from vector<1x1x1x1xf32>
    %cst_51 = arith.constant 1.562500e-02 : f32
    %81 = arith.mulf %80, %cst_51 : f32
    %82 = vector.broadcast %81 : f32 to vector<1x1xf32>
    %83 = arith.addf %75, %82 : vector<1x1xf32>
    %c2_52 = arith.constant 2 : index
    %c0_53 = arith.constant 0 : index
    %c0_54 = arith.constant 0 : index
    %84 = vector.load %arg10[%c2_52, %c0_53, %c0_54] : memref<3x1x1xf32, #tpu.memory_space<vmem>>, vector<1x1x1xf32>
    %85 = vector.shape_cast %84 : vector<1x1x1xf32> to vector<1x1xf32>
    %86 = vector.shape_cast %83 : vector<1x1xf32> to vector<1x1x1xf32>
    tpu.vector_store %arg10[%c2_52, %c0_53, %c0_54], %86 {strides = array<i32>} : memref<3x1x1xf32, #tpu.memory_space<vmem>>, vector<1x1x1xf32>,
    return
  }
}

</mosaic_0001>

<bundles_post_ra>
// kernel: tpu_custom_call.1
= control target key start
LH: loop header
LB: loop body
LE: loop exit
PB: predicated region body
PF: predicated region fallthrough
CT: control target
= control target key end

     0   :  { %16 = vsyncpa [#allocation3], 0  ;;  %s1638_s17 = smov 0   ;;  %s2133_s0 = inlined_call_operand.vmem [shape: f32[2,1,32], index: 0, kind: input, shape index: {}]   ;;  %s2134_s1 = inlined_call_operand.vmem [shape: f32[2,32,256], index: 1, kind: input, shape index: {}]   ;;  %s2135_s2 = inlined_call_operand.vmem [shape: f32[2,1,128], index: 2, kind: input, shape index: {}]   ;;  %s2136_s3 = inlined_call_operand.vmem [shape: f32[2,1,128], index: 3, kind: input, shape index: {}]   ;;  %s2137_s4 = inlined_call_operand.vmem [shape: f32[2,128,32], index: 4, kind: input, shape index: {}]   ;;  %s2138_s5 = inlined_call_operand.vmem [shape: f32[3,1,32], index: 5, kind: input, shape index: {}]   ;;  %s2139_s6 = inlined_call_operand.vmem [shape: f32[3,1,128], index: 6, kind: input, shape index: {}]   ;;  %s2140_s7 = inlined_call_operand.vmem [shape: f32[3,1,32], index: 7, kind: input, shape index: {}]   ;;  %s2141_s8 = inlined_call_operand.vmem [shape: f32[3,1,32], index: 8, kind: input, shape index: {}]   ;;  %s2142_s9 = inlined_call_operand.hbm [shape: f32[2,1,32], index: 9, kind: output, shape index: {0}]   ;;  %s2143_s10 = inlined_call_operand.vmem [shape: f32[3,1,1], index: 10, kind: output, shape index: {1}]  }
   0x1   :  { %v35_v0 = vld [vmem:[%s2133_s0] sm:$0x1]   ;;  %v36_v1 = vld [vmem:[%s2133_s0 + $0x1] sm:$0x1]  }
   0x2 LB: > { %v46_v2 = vld [vmem:[%s2134_s1 + $0x8] sm:$0xff]  ;;  %v48_v3 = vld [vmem:[%s2134_s1 + $0x18] sm:$0xff]  ;;  %v45_v7 = vld [vmem:[%s2134_s1] sm:$0xff]  ;;  %v1564_v9 = vmov 0.0   ;;  %vm61_vm0 = vcmask 261120   ;;  %p1079_p0 = scmp.le.s32.totalorder %s1562_s17, 0  ;;  %s1562_s17 = sphi %s1638_s17, %s42_s17   ;;  %v1558_v0 = vphi %v35_v0, %v2147_v0   ;;  %v1554_v1 = vphi %v36_v1, %v2146_v1  }
   0x3   : > { %v54_v4 = vld [vmem:[%s2134_s1 + $0x48] sm:$0xff]  ;;  %v1333_v5 = vpack.c.bf16 %v48_v3, %v46_v2  ;;  %v56_v6 = vld [vmem:[%s2134_s1 + $0x58] sm:$0xff]  ;;  %v47_v8 = vld [vmem:[%s2134_s1 + $0x10] sm:$0xff]  ;;  %129 = vmatprep.mubr.f32.mxu0 %v1564_v9  ;;  %203 = vmatprep.mubr.f32.mxu1 %v1564_v9  ;;  %vm220_vm1 = vcmask (!%p1079_p0), 1040384   ;;  %s1080_s13 = sadd.s32 (!%p1079_p0), 4294967295, %s1562_s17  ;;  %vm238_vm2 = vcmask (!%p1079_p0), 0  }
   0x4   : > { %v1341_v10 = vpack.c.bf16 %v56_v6, %v54_v4  ;;  %v1335_v11 = vpack.c.bf16 %v47_v8, %v45_v7  ;;  %v53_v12 = vld [vmem:[%s2134_s1 + $0x40] sm:$0xff]  ;;  %v55_v13 = vld [vmem:[%s2134_s1 + $0x50] sm:$0xff]  ;;  %v50_v14 = vld [vmem:[%s2134_s1 + $0x28] sm:$0xff]  ;;  %s237_s19 = scalar_lea.vmem (!%p1079_p0), %s2143_s10, %s1080_s13 }
   0x5   : > { %1334 = vmatprep.subr.bf16.mxu0 %v1333_v5  ;;  %v1343_v15 = vpack.c.bf16 %v55_v13, %v53_v12  ;;  %v52_v16 = vld [vmem:[%s2134_s1 + $0x38] sm:$0xff]  ;;  %v58_v17 = vld [vmem:[%s2134_s1 + $0x68] sm:$0xff]  ;;  %v49_v21 = vld [vmem:[%s2134_s1 + $0x20] sm:$0xff] }
   0x6   : > { %v60_v18 = vld [vmem:[%s2134_s1 + $0x78] sm:$0xff]  ;;  %1342 = vmatprep.subr.bf16.mxu1 %v1341_v10  ;;  %1336 = vmatpush1.bf16.msra.mxu0 %v1335_v11  ;;  %v1337_v19 = vpack.c.bf16 %v52_v16, %v50_v14  ;;  %v51_v22 = vld [vmem:[%s2134_s1 + $0x30] sm:$0xff]  ;;  %v57_v23 = vld [vmem:[%s2134_s1 + $0x60] sm:$0xff] }
   0x7   : > { %v1345_v20 = vpack.c.bf16 %v60_v18, %v58_v17  ;;  %1344 = vmatpush1.bf16.msra.mxu1 %v1343_v15  ;;  %v1339_v24 = vpack.c.bf16 %v51_v22, %v49_v21  ;;  %v59_v25 = vld [vmem:[%s2134_s1 + $0x70] sm:$0xff]  ;;  %v214_v31 = vld [vmem:[%s2136_s3] sm:$0x1] (!%p1079_p0)  ;;  %v215_v32 = vld [vmem:[%s2136_s3 + $0x1] sm:$0x1] (!%p1079_p0) }
   0x8   : > { %1338 = vmatprep.subr.bf16.mxu0 %v1337_v19  ;;  %v1347_v26 = vpack.c.bf16 %v59_v25, %v57_v23 }
   0x9   : > { %1346 = vmatprep.subr.bf16.mxu1 %v1345_v20 }
   0xa   : > { %1340 = vmatpush1.bf16.msra.mxu0 %v1339_v24 }
   0xb   : > { %1348 = vmatpush1.bf16.msra.mxu1 %v1347_v26 }
   0xd   : > { %1077 = vmatmul.mubr.msk.f32.vlgmr.msra.gmra.mrb[0].mxu0 %vm61_vm0, %v1558_v0 }
   0xe   : > { %1078 = vmatmul.mubr.msk.f32.vlgmr.msra.gmra.mrb[0].mxu1 %vm61_vm0, %v1554_v1 }
  0xdc   : > { %213 = sbr.rel (%p1079_p0) target bundleno = 442 (0x1ba), region = 48 }
  0xe0   : > { %v1703_v27 = vpop.f32.mrb[0].mxu0 }
  0xe1   : > { %v1705_v28 = vpop.f32.mrb[0].mxu1  ;;  %v133_v29 = vpop.f32.mrb[1].mxu0 }
  0xe2   : > { %v207_v30 = vpop.f32.mrb[1].mxu1  ;;  %v216_v33 = vsub.f32 (!%p1079_p0), %v214_v31, %v133_v29 }
  0xe3   : > { %v217_v34 = vsub.f32 %v215_v32, %v207_v30 }
  0xe4   : > { %v218_v35 = vmul.f32 %v216_v33, %v216_v33 }
  0xe5   : > { %v219_v36 = vmul.f32 %v217_v34, %v217_v34 }
  0xe6   : > { %v221_v37 = vsel %vm220_vm1, %v218_v35, 0.0 }
  0xe7   : > { %v222_v38 = vsel %vm220_vm1, %v219_v36, 0.0 }
  0xe8   : > { %v223_v39 = vadd.f32 %v222_v38, %v221_v37 }
  0xea   : > { %224 = vadd.xlane.f32.xlu0 %v223_v39 }
 0x177   : > { %v225_v40 = vpop.xlane.xlu0 %224 }
 0x178   : > { %v226_v41 = vrot.slane %v225_v40, 4 }
 0x17a   : > { %v227_v42 = vadd.f32 %v226_v41, %v225_v40 }
 0x17c   : > { %v228_v43 = vrot.slane %v227_v42, 2 }
 0x17e   : > { %v229_v44 = vadd.f32 %v228_v43, %v227_v42 }
 0x180   : > { %v230_v45 = vrot.slane %v229_v44, 1 }
 0x182   : > { %v231_v46 = vadd.f32 %v230_v45, %v229_v44 }
 0x184   : > { %1473 = vpush %v231_v46 }
 0x1b5   : > { %s1474_s14 = spop %1473 }
 0x1b6   : > { %s233_s15 = smul.f32 0.015625, %s1474_s14 }
 0x1b8   : > { %v234_v47 = vstv %s233_s15 }
 0x1b9   : > { %239 = vst.msk [vmem:[%s237_s19] sm:$0x1] %vm238_vm2, %v234_v47 }
 0x1ba PF: > { %v248_v48 = vld [vmem:[%s2137_s4] sm:$0xff]  ;;  %v249_v49 = vld [vmem:[%s2137_s4 + $0x8] sm:$0xff]  ;;  %v1565_v51 = vmov 0.0|0.0   ;;  %v250_v54 = vld [vmem:[%s2137_s4 + $0x10] sm:$0xff]  ;;  %vm1566_vm3 = vmmov 0   ;;  %s244_s23 = scalar_lea.vmem %s2139_s6, %s1562_s17  ;;  %s420_s12 = scalar_lea.vmem %s2138_s5, %s1562_s17  ;;  %vm426_vm4 = vcmask 253952  }
 0x1bb   : > { %v264_v50 = vld [vmem:[%s2137_s4 + $0x80] sm:$0xff]  ;;  %1349 = vmatprep.subr.bf16.mxu0 %v1565_v51  ;;  %1373 = vmatprep.subr.bf16.mxu1 %v1565_v51  ;;  %v1350_v52 = vpack.c.bf16 %v249_v49, %v248_v48  ;;  %v265_v53 = vld [vmem:[%s2137_s4 + $0x88] sm:$0xff]  ;;  %v251_v55 = vld [vmem:[%s2137_s4 + $0x18] sm:$0xff]  ;;  %s444_s15 = scalar_lea.vmem %s2140_s7, %s1562_s17  ;;  %s448_s19 = scalar_lea.vmem %s2141_s8, %s1562_s17 }
 0x1bc   : > { %v1374_v56 = vpack.c.bf16 %v265_v53, %v264_v50  ;;  %v266_v57 = vld [vmem:[%s2137_s4 + $0x90] sm:$0xff]  ;;  %v267_v58 = vld [vmem:[%s2137_s4 + $0x98] sm:$0xff]  ;;  %1203 = vmatprep.mubr.msk.f32.mxu0 %vm1566_vm3, %v1564_v9  ;;  %1238 = vmatprep.mubr.msk.f32.mxu1 %vm1566_vm3, %v1564_v9  ;;  %v1353_v59 = vpack.c.bf16 %v251_v55, %v250_v54  ;;  %v252_v61 = vld [vmem:[%s2137_s4 + $0x20] sm:$0xff]  ;;  %s42_s17 = sadd.s32 1, %s1562_s17  }
 0x1bd   : > { %1351 = vmatpush3.bf16.msra.mxu0 %v1350_v52  ;;  %v1377_v60 = vpack.c.bf16 %v267_v58, %v266_v57  ;;  %v253_v62 = vld [vmem:[%s2137_s4 + $0x28] sm:$0xff]  ;;  %v268_v63 = vld [vmem:[%s2137_s4 + $0xa0] sm:$0xff]  ;;  %v254_v5 = vld [vmem:[%s2137_s4 + $0x30] sm:$0xff]  ;;  %p39_p1 = scmp.ge.s32.totalorder %s42_s17, 2  }
 0x1be   : > { %1375 = vmatpush3.bf16.msra.mxu1 %v1374_v56  ;;  %1352 = vmatprep.subr.bf16.mxu0 %v1565_v51  ;;  %v269_v2 = vld [vmem:[%s2137_s4 + $0xa8] sm:$0xff]  ;;  %v1356_v3 = vpack.c.bf16 %v253_v62, %v252_v61  ;;  %v255_v6 = vld [vmem:[%s2137_s4 + $0x38] sm:$0xff]  ;;  %v270_v7 = vld [vmem:[%s2137_s4 + $0xb0] sm:$0xff]  ;;  %vm1569_vm5 = vmmov (%p39_p1), 0   ;;  %vm625_vm6 = vcmask (%p39_p1), 1040384   ;;  %vm642_vm7 = vcmask (%p39_p1), 0  }
 0x1bf   : > { %1376 = vmatprep.subr.bf16.mxu1 %v1565_v51  ;;  %v1380_v4 = vpack.c.bf16 %v269_v2, %v268_v63  ;;  %v271_v8 = vld [vmem:[%s2137_s4 + $0xb8] sm:$0xff]  ;;  %v1359_v9 = vpack.c.bf16 %v255_v6, %v254_v5  ;;  %v256_v11 = vld [vmem:[%s2137_s4 + $0x40] sm:$0xff]  ;;  %v257_v12 = vld [vmem:[%s2137_s4 + $0x48] sm:$0xff]  ;;  %s1570_s24 = smov (%p39_p1), [#allocation2]  }
 0x1c0   : > { %v1383_v10 = vpack.c.bf16 %v271_v8, %v270_v7  ;;  %v272_v13 = vld [vmem:[%s2137_s4 + $0xc0] sm:$0xff]  ;;  %v273_v14 = vld [vmem:[%s2137_s4 + $0xc8] sm:$0xff]  ;;  %v1362_v15 = vpack.c.bf16 %v257_v12, %v256_v11  ;;  %v258_v17 = vld [vmem:[%s2137_s4 + $0x50] sm:$0xff]  ;;  %s1046_s25 = sshll.u32 (%p39_p1), %s1570_s24, 4  ;;  %s1047_s25 = int_to_ptr.vmem [resolvable:$true] %s1046_s25 }
 0x1c1   : > { %1354 = vmatpush3.bf16.msra.mxu0 %v1353_v59  ;;  %v1386_v16 = vpack.c.bf16 %v273_v14, %v272_v13  ;;  %v259_v18 = vld [vmem:[%s2137_s4 + $0x58] sm:$0xff]  ;;  %v274_v19 = vld [vmem:[%s2137_s4 + $0xd0] sm:$0xff]  ;;  %v260_v23 = vld [vmem:[%s2137_s4 + $0x60] sm:$0xff]  ;;  %s1516_s26 = scalar_lea.vmem (%p39_p1), %s1047_s25, 32  ;;  %p1521_p3 = scmp.lt.s32.totalorder (%p39_p1), %s1047_s25, %s1047_s25 }
 0x1c2   : > { %1378 = vmatpush3.bf16.msra.mxu1 %v1377_v60  ;;  %1355 = vmatprep.subr.bf16.mxu0 %v1565_v51  ;;  %v275_v20 = vld [vmem:[%s2137_s4 + $0xd8] sm:$0xff]  ;;  %v1365_v21 = vpack.c.bf16 %v259_v18, %v258_v17  ;;  %v261_v24 = vld [vmem:[%s2137_s4 + $0x68] sm:$0xff]  ;;  %v276_v25 = vld [vmem:[%s2137_s4 + $0xe0] sm:$0xff]  ;;  %v1567_v18 = vmov (%p39_p1), 0.0   ;;  %p1517_p2 = scmp.ne.s32.totalorder (%p39_p1), %s1047_s25, %s1516_s26  ;;  %p1522_p4 = scmp.lt.s32.totalorder (%p39_p1), %s1516_s26, %s1516_s26 }
 0x1c3   : > { %1379 = vmatprep.subr.bf16.mxu1 %v1565_v51  ;;  %v1389_v22 = vpack.c.bf16 %v275_v20, %v274_v19  ;;  %v277_v26 = vld [vmem:[%s2137_s4 + $0xe8] sm:$0xff]  ;;  %v1368_v29 = vpack.c.bf16 %v261_v24, %v260_v23  ;;  %v240_v30 = vld [vmem:[%s2135_s2] sm:$0x1]  ;;  %v262_v32 = vld [vmem:[%s2137_s4 + $0x70] sm:$0xff] }
 0x1c4   : > { %v1392_v31 = vpack.c.bf16 %v277_v26, %v276_v25  ;;  %v263_v33 = vld [vmem:[%s2137_s4 + $0x78] sm:$0xff]  ;;  %v241_v34 = vld [vmem:[%s2135_s2 + $0x1] sm:$0x1]  ;;  %v278_v35 = vld [vmem:[%s2137_s4 + $0xf0] sm:$0xff]  ;;  %v242_v37 = vsub.f32 %v1703_v27, %v240_v30  ;;  %p1523_p5 = por (%p39_p1), %p1522_p4, %p1521_p3 }
 0x1c5   : > { %1357 = vmatpush3.bf16.msra.mxu0 %v1356_v3  ;;  %v279_v36 = vld [vmem:[%s2137_s4 + $0xf8] sm:$0xff]  ;;  %v1371_v38 = vpack.c.bf16 %v263_v33, %v262_v32  ;;  %v245_v39 = vld [vmem:[%s244_s23] sm:$0x1]  ;;  %v243_v40 = vsub.f32 %v1705_v28, %v241_v34  ;;  %v455_v11 = vld [vmem:[%s2134_s1 + $0x8] sm:$0xff] (%p39_p1) }
 0x1c6   : > { %1381 = vmatpush3.bf16.msra.mxu1 %v1380_v4  ;;  %1358 = vmatprep.subr.bf16.mxu0 %v1565_v51  ;;  %v1395_v41 = vpack.c.bf16 %v279_v36, %v278_v35  ;;  %v246_v42 = vmul.f32 %v245_v39, %v242_v37  ;;  %v421_v27 = vld [vmem:[%s420_s12] sm:$0x1]  ;;  %v457_v12 = vld [vmem:[%s2134_s1 + $0x18] sm:$0xff] (%p39_p1)  ;;  %v463_v13 = vld [vmem:[%s2134_s1 + $0x48] sm:$0xff] (%p39_p1)  ;;  %p1524_p6 = pnand (%p39_p1), %p1523_p5, %p1517_p2 }
 0x1c7   : > { %1382 = vmatprep.subr.bf16.mxu1 %v1565_v51  ;;  %v247_v43 = vmul.f32 %v245_v39, %v243_v40  ;;  %v422_v44 = vmul.f32 %v1558_v0, %v421_v27  ;;  %v423_v28 = vmul.f32 %v1554_v1, %v421_v27  ;;  %v445_v63 = vld [vmem:[%s444_s15] sm:$0x1]  ;;  %v1884_v14 = vpack.c.bf16 (%p39_p1), %v457_v12, %v455_v11  ;;  %v456_v17 = vld [vmem:[%s2134_s1 + $0x10] sm:$0xff] (%p39_p1)  ;;  %v459_v23 = vld [vmem:[%s2134_s1 + $0x28] sm:$0xff] (%p39_p1) }
 0x1c8   : > { %v449_v4 = vld [vmem:[%s448_s19] sm:$0x1]  ;;  %v461_v25 = vld [vmem:[%s2134_s1 + $0x38] sm:$0xff] (%p39_p1)  ;;  %v467_v26 = vld [vmem:[%s2134_s1 + $0x68] sm:$0xff] (%p39_p1) }
 0x1c9   : > { %1360 = vmatpush3.bf16.msra.mxu0 %v1359_v9  ;;  %v1919_v30 = vpack.c.bf16 (%p39_p1), %v461_v25, %v459_v23  ;;  %v458_v32 = vld [vmem:[%s2134_s1 + $0x20] sm:$0xff] (%p39_p1)  ;;  %v460_v33 = vld [vmem:[%s2134_s1 + $0x30] sm:$0xff] (%p39_p1)  ;;  %v665_v12 = vld [vmem:[%s2137_s4 + $0x68] sm:$0xff] (%p39_p1) }
 0x1ca   : > { %1384 = vmatpush3.bf16.msra.mxu1 %v1383_v10  ;;  %1361 = vmatprep.subr.bf16.mxu0 %v1565_v51  ;;  %v466_v34 = vld [vmem:[%s2134_s1 + $0x60] sm:$0xff] (%p39_p1)  ;;  %v1403_v35 = vpack.c.bf16 (%p39_p1), %v460_v33, %v458_v32  ;;  %v468_v36 = vld [vmem:[%s2134_s1 + $0x70] sm:$0xff] (%p39_p1) }
 0x1cb   : > { %1385 = vmatprep.subr.bf16.mxu1 %v1565_v51  ;;  %v652_v37 = vld [vmem:[%s2137_s4] sm:$0xff] (%p39_p1)  ;;  %v1411_v39 = vpack.c.bf16 (%p39_p1), %v468_v36, %v466_v34  ;;  %v682_v23 = vld [vmem:[%s2137_s4 + $0xf0] sm:$0xff] (%p39_p1) }
 0x1cc   :  { %v668_v40 = vld [vmem:[%s2137_s4 + $0x80] sm:$0xff] (%p39_p1) }
 0x1cd   : > { %1363 = vmatpush3.bf16.msra.mxu0 %v1362_v15  ;;  %v465_v15 = vld [vmem:[%s2134_s1 + $0x58] sm:$0xff] (%p39_p1)  ;;  %v664_v11 = vld [vmem:[%s2137_s4 + $0x60] sm:$0xff] (%p39_p1) }
 0x1ce   : > { %1387 = vmatpush3.bf16.msra.mxu1 %v1386_v16  ;;  %1364 = vmatprep.subr.bf16.mxu0 %v1565_v51  ;;  %v454_v16 = vld [vmem:[%s2134_s1] sm:$0xff] (%p39_p1)  ;;  %v1897_v19 = vpack.c.bf16 (%p39_p1), %v465_v15, %v463_v13  ;;  %v681_v15 = vld [vmem:[%s2137_s4 + $0xe8] sm:$0xff] (%p39_p1) }
 0x1cf   : > { %1388 = vmatprep.subr.bf16.mxu1 %v1565_v51  ;;  %v1399_v20 = vpack.c.bf16 (%p39_p1), %v456_v17, %v454_v16  ;;  %v680_v13 = vld [vmem:[%s2137_s4 + $0xe0] sm:$0xff] (%p39_p1)  ;;  %v1432_v16 = vpack.c.bf16 (%p39_p1), %v665_v12, %v664_v11 }
 0x1d0   :  { %v1456_v17 = vpack.c.bf16 (%p39_p1), %v681_v15, %v680_v13  ;;  %v619_v32 = vld [vmem:[%s2136_s3] sm:$0x1] (%p39_p1)  ;;  %v1084_v34 = vld [vmem:[%s2139_s6 + $0x2] sm:$0x1] (%p39_p1) }
 0x1d1   : > { %1366 = vmatpush3.bf16.msra.mxu0 %v1365_v21  ;;  %v462_v21 = vld [vmem:[%s2134_s1 + $0x40] sm:$0xff] (%p39_p1) }
 0x1d2   : > { %1390 = vmatpush3.bf16.msra.mxu1 %v1389_v22  ;;  %1367 = vmatprep.subr.bf16.mxu0 %v1565_v51  ;;  %v464_v22 = vld [vmem:[%s2134_s1 + $0x50] sm:$0xff] (%p39_p1)  ;;  %v1087_v13 = vld [vmem:[%s2141_s8 + $0x2] sm:$0x1] (%p39_p1) }
 0x1d3   : > { %1391 = vmatprep.subr.bf16.mxu1 %v1565_v51  ;;  %v1407_v24 = vpack.c.bf16 (%p39_p1), %v464_v22, %v462_v21  ;;  %v667_v21 = vld [vmem:[%s2137_s4 + $0x78] sm:$0xff] (%p39_p1) }
 0x1d5   : > { %1369 = vmatpush3.bf16.msra.mxu0 %v1368_v29  ;;  %v469_v29 = vld [vmem:[%s2134_s1 + $0x78] sm:$0xff] (%p39_p1) }
 0x1d6   : > { %1393 = vmatpush3.bf16.msra.mxu1 %v1392_v31  ;;  %1370 = vmatprep.subr.bf16.mxu0 %v1565_v51  ;;  %v1921_v31 = vpack.c.bf16 (%p39_p1), %v469_v29, %v467_v26  ;;  %v644_v26 = vld [vmem:[%s2135_s2] sm:$0x1] (%p39_p1)  ;;  %v645_v29 = vld [vmem:[%s2135_s2 + $0x1] sm:$0x1] (%p39_p1) }
 0x1d7   : > { %1394 = vmatprep.subr.bf16.mxu1 %v1565_v51 }
 0x1d9   : > { %1372 = vmatpush3.bf16.msra.mxu0 %v1371_v38  ;;  %v653_v38 = vld [vmem:[%s2137_s4 + $0x8] sm:$0xff] (%p39_p1) }
 0x1da   : > { %1396 = vmatpush3.bf16.msra.mxu1 %v1395_v41  ;;  %1398 = vmatprep.subr.bf16.mxu0 (%p39_p1), %v1884_v14  ;;  %v669_v41 = vld [vmem:[%s2137_s4 + $0x88] sm:$0xff] (%p39_p1) }
 0x1db   :  { %1406 = vmatprep.subr.bf16.mxu1 (%p39_p1), %v1897_v19  ;;  %v1438_v27 = vpack.c.bf16 (%p39_p1), %v669_v41, %v668_v40 }
 0x1dc   : > { %1204 = vmatmul.mubr.f32.vlgmr.msra.gmra.mrb[2].mxu0 %v246_v42  ;;  %v1414_v42 = vpack.c.bf16 (%p39_p1), %v653_v38, %v652_v37 }
 0x1dd   : > { %1239 = vmatmul.mubr.f32.vlgmr.msra.gmra.mrb[2].mxu1 %v247_v43  ;;  %538 = vmatprep.mubr.f32.mxu0 (%p39_p1), %v1567_v18  ;;  %v1568_v43 = vmov (%p39_p1), 0.0|0.0  }
 0x1de   :  { %612 = vmatprep.mubr.f32.mxu1 (%p39_p1), %v1567_v18  ;;  %1400 = vmatpush1.bf16.msra.mxu0 (%p39_p1), %v1399_v20  ;;  %v666_v20 = vld [vmem:[%s2137_s4 + $0x70] sm:$0xff] (%p39_p1) }
 0x1df   :  { %1408 = vmatpush1.bf16.msra.mxu1 (%p39_p1), %v1407_v24  ;;  %1402 = vmatprep.subr.bf16.mxu0 (%p39_p1), %v1919_v30  ;;  %v1435_v22 = vpack.c.bf16 (%p39_p1), %v667_v21, %v666_v20  ;;  %v683_v24 = vld [vmem:[%s2137_s4 + $0xf8] sm:$0xff] (%p39_p1) }
 0x1e0   :  { %1410 = vmatprep.subr.bf16.mxu1 (%p39_p1), %v1921_v31  ;;  %v1459_v25 = vpack.c.bf16 (%p39_p1), %v683_v24, %v682_v23 }
 0x1e2   :  { %1404 = vmatpush1.bf16.msra.mxu0 (%p39_p1), %v1403_v35  ;;  %v620_v35 = vld [vmem:[%s2136_s3 + $0x1] sm:$0x1] (%p39_p1) }
 0x1e3   :  { %1412 = vmatpush1.bf16.msra.mxu1 (%p39_p1), %v1411_v39  ;;  %1413 = vmatprep.subr.bf16.mxu0 (%p39_p1), %v1568_v43 }
 0x1e4   :  { %1437 = vmatprep.subr.bf16.mxu1 (%p39_p1), %v1568_v43 }
 0x2af   : > { %v346_v45 = vpop.f32.mrb[2].mxu0 }
 0x2b0   : > { %v424_v46 = vadd.f32 %v422_v44, %v346_v45  ;;  %v416_v47 = vpop.f32.mrb[2].mxu1  ;;  %v1205_v48 = vpop.f32.mrb[3].mxu0  ;;  %v654_v44 = vld [vmem:[%s2137_s4 + $0x10] sm:$0xff] (%p39_p1) }
 0x2b1   : > { %v425_v49 = vadd.f32 %v423_v28, %v416_v47  ;;  %v1240_v50 = vpop.f32.mrb[3].mxu1  ;;  %v655_v28 = vld [vmem:[%s2137_s4 + $0x18] sm:$0xff] (%p39_p1)  ;;  %v670_v45 = vld [vmem:[%s2137_s4 + $0x90] sm:$0xff] (%p39_p1) }
 0x2b2   : > { %v427_v51 = vsel %vm426_vm4, %v424_v46, 0.0  ;;  %v1417_v47 = vpack.c.bf16 (%p39_p1), %v655_v28, %v654_v44  ;;  %v657_v50 = vld [vmem:[%s2137_s4 + $0x28] sm:$0xff] (%p39_p1) }
 0x2b3   : > { %v428_v52 = vsel %vm426_vm4, %v425_v49, 0.0 }
 0x2b4   : > { %v429_v53 = vadd.f32 %v428_v52, %v427_v51  ;;  %v672_v51 = vld [vmem:[%s2137_s4 + $0xa0] sm:$0xff] (%p39_p1)  ;;  %v673_v52 = vld [vmem:[%s2137_s4 + $0xa8] sm:$0xff] (%p39_p1) }
 0x2b6   : > { %v431_v54 = vmul.f32 0.5, %v429_v53 }
 0x2b8   : > { %v432_v55 = vsub.f32 %v424_v46, %v431_v54  ;;  %v433_v56 = vsub.f32 %v425_v49, %v431_v54  ;;  %v671_v46 = vld [vmem:[%s2137_s4 + $0x98] sm:$0xff] (%p39_p1)  ;;  %v656_v49 = vld [vmem:[%s2137_s4 + $0x20] sm:$0xff] (%p39_p1)  ;;  %v1444_v54 = vpack.c.bf16 (%p39_p1), %v673_v52, %v672_v51 }
 0x2b9   :  { %v1441_v48 = vpack.c.bf16 (%p39_p1), %v671_v46, %v670_v45  ;;  %v1420_v53 = vpack.c.bf16 (%p39_p1), %v657_v50, %v656_v49 }
 0x2ba   : > { %v434_v0 = vmul.f32 %v432_v55, %v432_v55  ;;  %v435_v57 = vmul.f32 %v433_v56, %v433_v56 }
 0x2bc   : > { %v436_v1 = vsel %vm426_vm4, %v434_v0, 0.0  ;;  %v437_v58 = vsel %vm426_vm4, %v435_v57, 0.0  ;;  %v675_v57 = vld [vmem:[%s2137_s4 + $0xb8] sm:$0xff] (%p39_p1) }
 0x2bd   : > { %v438_v59 = vadd.f32 %v437_v58, %v436_v1 }
 0x2bf   : > { %v439_v60 = vmul.f32 0.5, %v438_v59  ;;  %v660_v59 = vld [vmem:[%s2137_s4 + $0x40] sm:$0xff] (%p39_p1) }
 0x2c1   : > { %v440_v61 = vadd.f32 1e-05, %v439_v60  ;;  %v661_v60 = vld [vmem:[%s2137_s4 + $0x48] sm:$0xff] (%p39_p1) }
 0x2c3   : > { %1512 = vrsqrt.f32 %v440_v61  ;;  %v676_v61 = vld [vmem:[%s2137_s4 + $0xc0] sm:$0xff] (%p39_p1) }
 0x2cd   : > { %v1513_v62 = vpop.eup %1512 }
 0x2ce   : > { %v442_v2 = vmul.f32 %v1513_v62, %v432_v55  ;;  %v443_v3 = vmul.f32 %v1513_v62, %v433_v56  ;;  %v658_v55 = vld [vmem:[%s2137_s4 + $0x30] sm:$0xff] (%p39_p1)  ;;  %v659_v56 = vld [vmem:[%s2137_s4 + $0x38] sm:$0xff] (%p39_p1)  ;;  %v677_v62 = vld [vmem:[%s2137_s4 + $0xc8] sm:$0xff] (%p39_p1) }
 0x2d0   : > { %v446_v5 = vmul.f32 %v445_v63, %v442_v2  ;;  %v447_v6 = vmul.f32 %v445_v63, %v443_v3  ;;  %v1426_v63 = vpack.c.bf16 (%p39_p1), %v661_v60, %v660_v59  ;;  %v1450_v2 = vpack.c.bf16 (%p39_p1), %v677_v62, %v676_v61  ;;  %v662_v3 = vld [vmem:[%s2137_s4 + $0x50] sm:$0xff] (%p39_p1) }
 0x2d1   :  { %41 = sbr.rel (!%p39_p1) target bundleno = 2 (0x2), region = 86 }
 0x2d2   : > { %v450_v7 = vadd.f32 %v449_v4, %v446_v5  ;;  %v451_v8 = vadd.f32 %v449_v4, %v447_v6  ;;  %v663_v4 = vld [vmem:[%s2137_s4 + $0x58] sm:$0xff] (%p39_p1)  ;;  %v678_v5 = vld [vmem:[%s2137_s4 + $0xd0] sm:$0xff] (%p39_p1) }
 0x2d3   :  { %v679_v6 = vld [vmem:[%s2137_s4 + $0xd8] sm:$0xff] (%p39_p1) }
 0x2d4   : > { %v1862_v0 = vmax.f32 %v450_v7, 0.0   ;;  %v1864_v1 = vmax.f32 %v451_v8, 0.0   ;;  %v1429_v7 = vpack.c.bf16 (%p39_p1), %v663_v4, %v662_v3  ;;  %v1453_v8 = vpack.c.bf16 (%p39_p1), %v679_v6, %v678_v5 }
 0x2d6   : > { %v2144_v9 = vmov %v1862_v0  ;;  %v2145_v10 = vmov %v1864_v1 }
 0x2d7   : > { %v2146_v1 = vmov %v2145_v10  ;;  %v2147_v0 = vmov %v2144_v9  ;;  %1081 = vmatmul.mubr.msk.f32.vlgmr.msra.gmra.mrb[0].mxu0 (%p39_p1), %vm61_vm0, %v2144_v9  ;;  %1082 = vmatmul.mubr.msk.f32.vlgmr.msra.gmra.mrb[0].mxu1 (%p39_p1), %vm61_vm0, %v2145_v10 }
 0x2d8   :  { %1415 = vmatpush3.bf16.msra.mxu0 %v1414_v42  ;;  %1439 = vmatpush3.bf16.msra.mxu1 %v1438_v27  ;;  %v674_v0 = vld [vmem:[%s2137_s4 + $0xb0] sm:$0xff]  ;;  %v1423_v1 = vpack.c.bf16 %v659_v56, %v658_v55 }
 0x2d9   :  { %1416 = vmatprep.subr.bf16.mxu0 %v1568_v43  ;;  %1440 = vmatprep.subr.bf16.mxu1 %v1568_v43  ;;  %v1447_v58 = vpack.c.bf16 %v675_v57, %v674_v0 }
 0x2da   :  { %1273 = vmatprep.mubr.msk.f32.mxu0 %vm1569_vm5, %v1567_v18  ;;  %1308 = vmatprep.mubr.msk.f32.mxu1 %vm1569_vm5, %v1567_v18 }
 0x2dc   :  { %1418 = vmatpush3.bf16.msra.mxu0 %v1417_v47  ;;  %1442 = vmatpush3.bf16.msra.mxu1 %v1441_v48 }
 0x2dd   :  { %1419 = vmatprep.subr.bf16.mxu0 %v1568_v43  ;;  %1443 = vmatprep.subr.bf16.mxu1 %v1568_v43 }
 0x2e0   :  { %1421 = vmatpush3.bf16.msra.mxu0 %v1420_v53  ;;  %1445 = vmatpush3.bf16.msra.mxu1 %v1444_v54 }
 0x2e1   :  { %1422 = vmatprep.subr.bf16.mxu0 %v1568_v43  ;;  %1446 = vmatprep.subr.bf16.mxu1 %v1568_v43 }
 0x2e4   :  { %1424 = vmatpush3.bf16.msra.mxu0 %v1423_v1  ;;  %1448 = vmatpush3.bf16.msra.mxu1 %v1447_v58 }
 0x2e5   :  { %1425 = vmatprep.subr.bf16.mxu0 %v1568_v43  ;;  %1449 = vmatprep.subr.bf16.mxu1 %v1568_v43 }
 0x2e8   :  { %1427 = vmatpush3.bf16.msra.mxu0 %v1426_v63  ;;  %1451 = vmatpush3.bf16.msra.mxu1 %v1450_v2 }
 0x2e9   :  { %1428 = vmatprep.subr.bf16.mxu0 %v1568_v43  ;;  %1452 = vmatprep.subr.bf16.mxu1 %v1568_v43 }
 0x2ec   :  { %1430 = vmatpush3.bf16.msra.mxu0 %v1429_v7  ;;  %1454 = vmatpush3.bf16.msra.mxu1 %v1453_v8  ;;  %v1086_v8 = vld [vmem:[%s2140_s7 + $0x2] sm:$0x1] }
 0x2ed   :  { %1431 = vmatprep.subr.bf16.mxu0 %v1568_v43  ;;  %1455 = vmatprep.subr.bf16.mxu1 %v1568_v43 }
 0x2f0   :  { %1433 = vmatpush3.bf16.msra.mxu0 %v1432_v16  ;;  %1457 = vmatpush3.bf16.msra.mxu1 %v1456_v17 }
 0x2f1   :  { %1434 = vmatprep.subr.bf16.mxu0 %v1568_v43  ;;  %1458 = vmatprep.subr.bf16.mxu1 %v1568_v43 }
 0x2f4   :  { %1436 = vmatpush3.bf16.msra.mxu0 %v1435_v22  ;;  %1460 = vmatpush3.bf16.msra.mxu1 %v1459_v25  ;;  %v1018_v25 = vld [vmem:[%s2136_s3] sm:$0x1] }
 0x2f5   :  { %1461 = vmatprep.subr.bf16.mxu0 %v1568_v43  ;;  %1467 = vmatprep.subr.bf16.mxu1 %v1568_v43 }
 0x3aa   :  { %v540_v33 = vpop.f32.mrb[0].mxu0  ;;  %v614_v37 = vpop.f32.mrb[0].mxu1 }
 0x3ab   :  { %v646_v36 = vsub.f32 %v540_v33, %v644_v26  ;;  %v542_v38 = vpop.f32.mrb[1].mxu0  ;;  %v647_v39 = vsub.f32 %v614_v37, %v645_v29  ;;  %v616_v41 = vpop.f32.mrb[1].mxu1  ;;  %v1019_v26 = vld [vmem:[%s2136_s3 + $0x1] sm:$0x1] }
 0x3ac   :  { %v621_v40 = vsub.f32 %v619_v32, %v542_v38  ;;  %v622_v27 = vsub.f32 %v620_v35, %v616_v41 }
 0x3ad   :  { %v650_v42 = vmul.f32 %v1084_v34, %v646_v36  ;;  %v651_v44 = vmul.f32 %v1084_v34, %v647_v39 }
 0x3ae   :  { %v623_v28 = vmul.f32 %v621_v40, %v621_v40  ;;  %v624_v45 = vmul.f32 %v622_v27, %v622_v27 }
 0x3af   :  { %1274 = vmatmul.mubr.f32.vlgmr.msra.gmra.mrb[2].mxu0 %v650_v42  ;;  %1309 = vmatmul.mubr.f32.vlgmr.msra.gmra.mrb[2].mxu1 %v651_v44 }
 0x3b0   :  { %v626_v46 = vsel %vm625_vm6, %v623_v28, 0.0  ;;  %1463 = vmatpush3.bf16.msra.mxu0 %v1884_v14  ;;  %v627_v47 = vsel %vm625_vm6, %v624_v45, 0.0  ;;  %1469 = vmatpush3.bf16.msra.mxu1 %v1897_v19 }
 0x3b1   :  { %1464 = vmatprep.subr.bf16.mxu0 %v1568_v43  ;;  %v628_v48 = vadd.f32 %v627_v47, %v626_v46  ;;  %1470 = vmatprep.subr.bf16.mxu1 %v1568_v43  ;;  %v1085_v43 = vld [vmem:[%s2138_s5 + $0x2] sm:$0x1] }
 0x3b2   :  { %1319 = vmatprep.mubr.msk.f32.mxu0 %vm1569_vm5, %v1567_v18  ;;  %1330 = vmatprep.mubr.msk.f32.mxu1 %vm1569_vm5, %v1567_v18  ;;  %v826_v18 = vmul.f32 %v1085_v43, %v2144_v9 }
 0x3b3   :  { %629 = vadd.xlane.f32.xlu0 %v628_v48 }
 0x3b4   :  { %1466 = vmatpush3.bf16.msra.mxu0 %v1919_v30  ;;  %1472 = vmatpush3.bf16.msra.mxu1 %v1921_v31  ;;  %v827_v30 = vmul.f32 %v1085_v43, %v2145_v10 }
 0x440   :  { %v630_v14 = vpop.xlane.xlu0 %629 }
 0x441   :  { %v631_v49 = vrot.slane %v630_v14, 4 }
 0x443   :  { %v632_v50 = vadd.f32 %v631_v49, %v630_v14 }
 0x445   :  { %v633_v19 = vrot.slane %v632_v50, 2 }
 0x447   :  { %v634_v51 = vadd.f32 %v633_v19, %v632_v50 }
 0x449   :  { %v635_v52 = vrot.slane %v634_v51, 1 }
 0x44b   :  { %v636_v53 = vadd.f32 %v635_v52, %v634_v51 }
 0x44d   :  { %1475 = vpush %v636_v53 }
 0x47e   :  { %s1476_s16 = spop %1475 }
 0x47f   :  { %s638_s1 = smul.f32 0.015625, %s1476_s16 }
 0x481   :  { %v639_v31 = vstv %s638_s1 }
 0x482   :  { %v750_v54 = vpop.f32.mrb[2].mxu0  ;;  %1083 = vst.msk [vmem:[%s2143_s10 + $0x1] sm:$0x1] %vm642_vm7, %v639_v31  ;;  %v820_v56 = vpop.f32.mrb[2].mxu1 }
 0x483   :  { %v828_v55 = vadd.f32 %v826_v18, %v750_v54  ;;  %v1275_v0 = vpop.f32.mrb[3].mxu0  ;;  %v829_v57 = vadd.f32 %v827_v30, %v820_v56  ;;  %v1310_v1 = vpop.f32.mrb[3].mxu1 }
 0x485   :  { %v831_v58 = vsel %vm426_vm4, %v828_v55, 0.0  ;;  %v832_v9 = vsel %vm426_vm4, %v829_v57, 0.0 }
 0x486   :  { %v833_v59 = vadd.f32 %v832_v9, %v831_v58 }
 0x488   :  { %v835_v60 = vmul.f32 0.5, %v833_v59 }
 0x48a   :  { %v836_v61 = vsub.f32 %v828_v55, %v835_v60  ;;  %v837_v10 = vsub.f32 %v829_v57, %v835_v60 }
 0x48c   :  { %v838_v62 = vmul.f32 %v836_v61, %v836_v61  ;;  %v839_v63 = vmul.f32 %v837_v10, %v837_v10 }
 0x48e   :  { %v840_v2 = vsel %vm426_vm4, %v838_v62, 0.0  ;;  %v841_v3 = vsel %vm426_vm4, %v839_v63, 0.0 }
 0x48f   :  { %v842_v4 = vadd.f32 %v841_v3, %v840_v2 }
 0x491   :  { %v843_v5 = vmul.f32 0.5, %v842_v4 }
 0x493   :  { %v844_v6 = vadd.f32 1e-05, %v843_v5 }
 0x495   :  { %1514 = vrsqrt.f32 %v844_v6 }
 0x49f   :  { %v1515_v7 = vpop.eup %1514 }
 0x4a0   :  { %v846_v11 = vmul.f32 %v1515_v7, %v836_v61  ;;  %v847_v12 = vmul.f32 %v1515_v7, %v837_v10 }
 0x4a2   :  { %v850_v15 = vmul.f32 %v1086_v8, %v846_v11  ;;  %v851_v16 = vmul.f32 %v1086_v8, %v847_v12 }
 0x4a4   :  { %v854_v17 = vadd.f32 %v1087_v13, %v850_v15  ;;  %v855_v20 = vadd.f32 %v1087_v13, %v851_v16 }
 0x4a6   :  { %v856_v21 = vmul.f32 2.0, %v854_v17  ;;  %v857_v22 = vmul.f32 2.0, %v855_v20 }
 0x4a8   :  { %v1088_v23 = vclamps-f32 %v856_v21, 1.0  ;;  %v1089_v24 = vclamps-f32 %v857_v22, 1.0 }
 0x4aa   :  { %1320 = vmatmul.mubr.msk.f32.vlgmr.msra.gmra.mrb[4].mxu0 %vm61_vm0, %v1088_v23  ;;  %862 = vst.msk [vmem:[#allocation2] sm:$0x1] %vm426_vm4, %v1088_v23  ;;  %1331 = vmatmul.mubr.msk.f32.vlgmr.msra.gmra.mrb[4].mxu1 %vm61_vm0, %v1089_v24  ;;  %863 = vst.msk [vmem:[#allocation2 + $0x1] sm:$0x1] %vm426_vm4, %v1089_v24 }
 0x57d   :  { %v941_v29 = vpop.f32.mrb[4].mxu0  ;;  %v1014_v32 = vpop.f32.mrb[4].mxu1 }
 0x57e   :  { %v1020_v33 = vsub.f32 %v1018_v25, %v941_v29  ;;  %v1021_v34 = vsub.f32 %v1019_v26, %v1014_v32  ;;  %v1321_v35 = vpop.f32.mrb[5].mxu0  ;;  %v1332_v36 = vpop.f32.mrb[5].mxu1 }
 0x580   :  { %v1022_v37 = vmul.f32 %v1020_v33, %v1020_v33  ;;  %v1023_v38 = vmul.f32 %v1021_v34, %v1021_v34 }
 0x582   :  { %v1024_v39 = vsel %vm625_vm6, %v1022_v37, 0.0  ;;  %v1025_v40 = vsel %vm625_vm6, %v1023_v38, 0.0 }
 0x583   :  { %v1026_v41 = vadd.f32 %v1025_v40, %v1024_v39 }
 0x585   :  { %1027 = vadd.xlane.f32.xlu0 %v1026_v41 }
 0x586   :  { %1527 = shalt.err (!%p1524_p6)
}
 0x587   :  { %s1528_s27 = scalar_lea.hbm %s2142_s9, 32 }
 0x588   :  { %p1529_p7 = scmp.ne.s32.totalorder %s2142_s9, %s1528_s27  ;;  %p1532_p8 = scmp.lt.u32.totalorder %s1528_s27, %s2142_s9 }
 0x58a   :  { %p1534_p9 = pnand %p1532_p8, %p1529_p7 }
 0x58c   :  { %1537 = shalt.err (!%p1534_p9)
}
 0x58d   :  { %s1571_s11 = smov 16   ;;  %s1572_s12 = smov 1  }
 0x58e   :  { %1052 = dma.vmem_to_hbm [thread:$0]  %s1047_s25, 32, %s2142_s9, [#allocation3], %s1571_s11, %s1571_s11, %s1572_s12  }
 0x612   :  { %v1028_v42 = vpop.xlane.xlu0 %1027 }
 0x613   :  { %v1029_v27 = vrot.slane %v1028_v42, 4 }
 0x615   :  { %v1030_v44 = vadd.f32 %v1029_v27, %v1028_v42 }
 0x617   :  { %v1031_v28 = vrot.slane %v1030_v44, 2 }
 0x619   :  { %v1032_v45 = vadd.f32 %v1031_v28, %v1030_v44 }
 0x61b   :  { %v1033_v46 = vrot.slane %v1032_v45, 1 }
 0x61d   :  { %v1034_v47 = vadd.f32 %v1033_v46, %v1032_v45 }
 0x61f   :  { %1477 = vpush %v1034_v47 }
 0x650   :  { %s1478_s15 = spop %1477 }
 0x651   :  { %s1036_s2 = smul.f32 0.015625, %s1478_s15 }
 0x653   :  { %v1037_v48 = vstv %s1036_s2 }
 0x654   :  { %1092 = vst.msk [vmem:[%s2143_s10 + $0x2] sm:$0x1] %vm642_vm7, %v1037_v48 }
 0x655   :  { %1550 = dma.done.wait [#allocation3], 32  }
 0x656   :  { %1551 = vsyncadd [#allocation3], 4294967264 }
 0x657   :  { %1060 = vsyncpa [#allocation3], 1 }

</bundles_post_ra>
